<compile_context>
chip_gen: v5e
topology: v5e:2x2
jax: 0.10.0
libtpu: 0.0.40
codegen_flags: <defaults>
</compile_context>

<pallas_src>
import math
from functools import partial

import jax
import jax.numpy as jnp
from jax.experimental import pallas as pl
from jax.experimental.pallas import tpu as pltpu


def _round_up(a, b):
    return (a + b - 1) // b * b


def _elu1(t):
    # torch.nn.functional.elu(t) + 1.0
    return jnp.where(t > 0, t, jnp.exp(t) - 1.0) + 1.0


# ----------------------------------------------------------------------------
# Fused multi-output dense kernel:  y_i = x @ W_i  (no bias).
# One pass over x per (M, K) tile; bf16 MXU operands, f32 accumulation.
# Grid = (M tiles ["parallel"], K tiles ["arbitrary" reduction]).
# ----------------------------------------------------------------------------
def _make_fused_dense_kernel(n_out):
    def kernel(*refs):
        x_ref = refs[0]
        w_refs = refs[1:1 + n_out]
        o_refs = refs[1 + n_out:1 + 2 * n_out]
        acc_refs = refs[1 + 2 * n_out:]
        k = pl.program_id(1)

        @pl.when(k == 0)
        def _():
            for acc in acc_refs:
                acc[...] = jnp.zeros_like(acc)

        xb = x_ref[...].astype(jnp.bfloat16)          # read x tile ONCE
        for w_ref, acc in zip(w_refs, acc_refs):
            acc[...] += jnp.dot(xb, w_ref[...].astype(jnp.bfloat16),
                                preferred_element_type=jnp.float32)

        @pl.when(k == pl.num_programs(1) - 1)
        def _():
            for o_ref, acc in zip(o_refs, acc_refs):
                o_ref[...] = acc[...].astype(o_ref.dtype)

    return kernel


def fused_dense(x, weights, out_dtype=jnp.float32, block_m=512, block_k=512):
    """Compute [x @ W for W in weights] with a single pipelined pallas_call."""
    M, K = x.shape
    ns = [int(w.shape[1]) for w in weights]

    tm = min(block_m, _round_up(M, 8))
    tk = min(block_k, K)
    Mp = _round_up(M, tm)
    Kp = _round_up(K, tk)
    if Mp != M or Kp != K:
        x = jnp.pad(x, ((0, Mp - M), (0, Kp - K)))
        weights = [jnp.pad(w, ((0, Kp - K), (0, 0))) for w in weights]
    weights = list(weights)
    n_out = len(weights)

    outs = pl.pallas_call(
        _make_fused_dense_kernel(n_out),
        out_shape=[jax.ShapeDtypeStruct((Mp, n), out_dtype) for n in ns],
        grid=(Mp // tm, Kp // tk),
        in_specs=[pl.BlockSpec((tm, tk), lambda i, k: (i, k))]
                 + [pl.BlockSpec((tk, n), lambda i, k: (k, 0)) for n in ns],
        out_specs=[pl.BlockSpec((tm, n), lambda i, k: (i, 0)) for n in ns],
        scratch_shapes=[pltpu.VMEM((tm, n), jnp.float32) for n in ns],
        compiler_params=pltpu.CompilerParams(
            dimension_semantics=("parallel", "arbitrary")),
    )(x, *weights)
    outs = list(outs)
    if Mp != M:
        outs = [o[:M] for o in outs]
    return outs


# ----------------------------------------------------------------------------
# Recurrent compressive-memory attention kernel.
# Grid = (batch ["parallel"], segment-block ["arbitrary", innermost/sequential]).
# Each grid step processes `num_sub` consecutive segments (statically unrolled
# recurrence with static slice offsets).
# Scratch: mem (H, dk, dv) f32, z (H, dk) f32, carried across segments per batch.
# ----------------------------------------------------------------------------
def _cm_segment_kernel(q_ref, k_ref, v_ref, bsig_ref, out_ref, mem_ref, z_ref,
                       *, seg_len, num_sub):
    sc = pl.program_id(1)

    @pl.when(sc == 0)
    def _():
        mem_ref[...] = jnp.zeros_like(mem_ref)
        # z = ones(.., dk, 1) / dim_key
        z_ref[...] = jnp.full(z_ref.shape, 1.0 / z_ref.shape[1], dtype=z_ref.dtype)

    dk = q_ref.shape[-1]
    inv_sqrt_dk = 1.0 / (dk ** 0.5)

    # Hoisted out of the per-segment loop: betas gate is constant over the grid.
    bsig = bsig_ref[...][:, None, :].astype(jnp.float32)     # (H, 1, dv)

    # Statically unrolled recurrence over the `num_sub` segments of this block
    # (all slice offsets static -> cheap addressing, LLO scheduler visibility).
    for j in range(num_sub):
        s0 = j * seg_len
        q = q_ref[0, :, pl.ds(s0, seg_len), :]                # (H, L, dk) bf16
        k = k_ref[0, :, pl.ds(s0, seg_len), :]                # (H, L, dk) bf16
        v = v_ref[0, :, pl.ds(s0, seg_len), :]                # (H, L, dv) bf16

        qf = q.astype(jnp.float32)
        kf = k.astype(jnp.float32)

        # --- standard softmax attention inside the segment (bf16 MXU, f32 acc)
        # 1/sqrt(dk) folded into q (cheaper than scaling the (H,L,L) scores).
        q_scaled = (qf * inv_sqrt_dk).astype(jnp.bfloat16)
        scores = jnp.einsum("hld,hmd->hlm", q_scaled, k,
                            preferred_element_type=jnp.float32)
        scores = scores - jnp.max(scores, axis=-1, keepdims=True)
        p = jnp.exp(scores)
        p = p * pl.reciprocal(jnp.sum(p, axis=-1, keepdims=True), approx=True)
        dpa = jnp.einsum("hlm,hmd->hld", p.astype(jnp.bfloat16), v,
                         preferred_element_type=jnp.float32)

        sigma_q = _elu1(qf)                                   # (H, L, dk) f32
        sigma_k = _elu1(kf)                                   # (H, L, dk) f32

        mem = mem_ref[...]                                    # (H, dk, dv) f32
        z = z_ref[...]                                        # (H, dk)     f32

        # --- memory read (uses the memory from *before* this segment's update)
        att_mem_num = jnp.einsum("hld,hdv->hlv",
                                 sigma_q.astype(jnp.bfloat16),
                                 mem.astype(jnp.bfloat16),
                                 preferred_element_type=jnp.float32)
        att_mem_den = jnp.sum(sigma_q * z[:, None, :], axis=-1, keepdims=True)
        att_mem = att_mem_num * pl.reciprocal(att_mem_den, approx=True)

        # --- "linear" memory update (f32 accumulation in VMEM scratch)
        mem_ref[...] = mem + jnp.einsum("hld,hlv->hdv",
                                        sigma_k.astype(jnp.bfloat16), v,
                                        preferred_element_type=jnp.float32)
        z_ref[...] = z + jnp.sum(sigma_k, axis=1)

        # --- gated combination: g*a + (1-g)*b == b + g*(a - b)  (one fewer mul)
        att = dpa + bsig * (att_mem - dpa)                    # (H, L, dv) f32
        out_ref[0, j] = att.astype(out_ref.dtype)


def compressive_memory_forward(x, params, *, num_heads, dim_key, dim_value,
                               segment_length, seg_block_max=4):
    """Forward pass of CompressiveMemory (linear update, non-causal)."""
    Wq, Wk, Wv, Wo, betas = params
    B, S, D = x.shape
    H, dk, dv, L = num_heads, dim_key, dim_value, segment_length
    assert S % L == 0, "seq_len must be a multiple of segment_length here"
    nseg = S // L
    # Segments per grid step (amortizes per-grid-step overhead).  Kept modest so
    # the double-buffered bf16 blocks stay well inside the v7x 32 MiB scoped VMEM
    # default -- no vmem_limit_bytes override needed.
    seg_block = max(d for d in range(1, min(nseg, seg_block_max) + 1)
                    if nseg % d == 0)
    n_blk = nseg // seg_block

    # ---- fused Q/K/V projection (single pass over x), bf16 outputs; then the
    #      raw torch-style .view(B, H, S, d) -- a free reshape.
    x2d = x.reshape(B * S, D)
    q2d, k2d, v2d = fused_dense(x2d, (Wq, Wk, Wv), out_dtype=jnp.bfloat16)
    qp = q2d.reshape(B, H, S, dk)
    kp = k2d.reshape(B, H, S, dk)
    vp = v2d.reshape(B, H, S, dv)

    # sigmoid(betas) hoisted out of the kernel entirely (constant over the grid).
    bsig = jax.nn.sigmoid(betas.astype(jnp.float32)).reshape(H, dv)

    kernel = partial(_cm_segment_kernel, seg_len=L, num_sub=seg_block)
    att = pl.pallas_call(
        kernel,
        out_shape=jax.ShapeDtypeStruct((B, nseg, H, L, dv), jnp.bfloat16),
        grid=(B, n_blk),
        in_specs=[
            pl.BlockSpec((1, H, seg_block * L, dk), lambda b, s: (b, 0, s, 0)),
            pl.BlockSpec((1, H, seg_block * L, dk), lambda b, s: (b, 0, s, 0)),
            pl.BlockSpec((1, H, seg_block * L, dv), lambda b, s: (b, 0, s, 0)),
            pl.BlockSpec((H, dv), lambda b, s: (0, 0)),
        ],
        out_specs=pl.BlockSpec((1, seg_block, H, L, dv),
                               lambda b, s: (b, s, 0, 0, 0)),
        scratch_shapes=[
            pltpu.VMEM((H, dk, dv), jnp.float32),   # compressive memory
            pltpu.VMEM((H, dk), jnp.float32),       # normalization z
        ],
        compiler_params=pltpu.CompilerParams(
            dimension_semantics=("parallel", "arbitrary")),
    )(qp, kp, vp, bsig)

    # ---- torch per-segment raw `.view(B, L, H*dv)` + concat over segments is
    #      exactly a flat reinterpretation of (B, nseg, H, L, dv): free reshape,
    #      no transpose, no extra copies.
    att2d = att.reshape(B * S, H * dv)

    # ---- output projection (tiled, bf16 MXU, f32 output).
    out2d, = fused_dense(att2d, (Wo,), out_dtype=jnp.float32)
    return out2d.reshape(B, S, D)


# ----------------------------------------------------------------------------
# Pure-JAX reference (direct transcription of the PyTorch forward).
# ----------------------------------------------------------------------------
def reference_forward(x, params, *, num_heads, dim_key, dim_value, segment_length):
    Wq, Wk, Wv, Wo, betas = params
    B, S, D = x.shape
    H, dk, dv, L = num_heads, dim_key, dim_value, segment_length
    nseg = S // L

    x2d = x.reshape(B * S, D)
    kp = (x2d @ Wk).reshape(B, H, S, dk)
    vp = (x2d @ Wv).reshape(B, H, S, dv)
    qp = (x2d @ Wq).reshape(B, H, S, dk)

    mem = jnp.zeros((1, H, dk, dv), jnp.float32)
    z = jnp.ones((B, H, dk, 1), jnp.float32) / dk

    outs = []
    for i in range(nseg):
        sl = slice(i * L, (i + 1) * L)
        k = kp[:, :, sl, :]
        v = vp[:, :, sl, :]
        q = qp[:, :, sl, :]
        sigma_q = _elu1(q)
        scores = q @ jnp.swapaxes(k, -2, -1) / dk ** 0.5
        dpa = jax.nn.softmax(scores, axis=-1) @ v
        att_mem = (sigma_q @ mem) / (sigma_q @ z)
        sigma_k = _elu1(k)
        mem = mem + jnp.swapaxes(sigma_k, -2, -1) @ v
        z = z + jnp.swapaxes(
            jnp.sum(_elu1(k), axis=-2, keepdims=True), -2, -1
        )
        bsig = jax.nn.sigmoid(betas)
        att = bsig * att_mem + (1.0 - bsig) * dpa
        att = att.reshape(B, L, H * dv)   # same raw view as torch
        outs.append(att @ Wo)
    return jnp.concatenate(outs, axis=1)


def init_params(key, dim_input, dim_key, dim_value, num_heads):
    k1, k2, k3, k4, k5 = jax.random.split(key, 5)
    s_in = 1.0 / math.sqrt(dim_input)
    s_out = 1.0 / math.sqrt(num_heads * dim_value)
    Wq = jax.random.normal(k1, (dim_input, num_heads * dim_key), jnp.float32) * s_in
    Wk = jax.random.normal(k2, (dim_input, num_heads * dim_key), jnp.float32) * s_in
    Wv = jax.random.normal(k3, (dim_input, num_heads * dim_value), jnp.float32) * s_in
    Wo = jax.random.normal(k4, (num_heads * dim_value, dim_input), jnp.float32) * s_out
    betas = jax.random.normal(k5, (1, num_heads, 1, dim_value), jnp.float32)
    return Wq, Wk, Wv, Wo, betas


if __name__ == "__main__":
    # Small config: dim_input=32, dim_key=dim_value=16, heads=2,
    # segment_length=8, seq_len=16 (2 segments), batch=2.
    B, S, D = 2, 16, 32
    H, dk, dv, L = 2, 16, 16, 8

    key = jax.random.PRNGKey(0)
    kx, kparams = jax.random.split(key)
    x = jax.random.normal(kx, (B, S, D), jnp.float32)
    params = init_params(kparams, D, dk, dv, H)

    out = compressive_memory_forward(
        x, params, num_heads=H, dim_key=dk, dim_value=dv, segment_length=L
    )
    out = jax.block_until_ready(out)

    # Reference kept at true f32 matmul precision (the kernels intentionally run
    # bf16 MXU operands with f32 accumulation, so allow bf16-level tolerance).
    with jax.default_matmul_precision("highest"):
        ref = reference_forward(
            x, params, num_heads=H, dim_key=dk, dim_value=dv, segment_length=L
        )
        ref = jax.block_until_ready(ref)

    assert out.shape == (B, S, D), out.shape
    assert bool(jnp.all(jnp.isfinite(out)))
    assert bool(jnp.allclose(out, ref, rtol=2e-2, atol=3e-2)), (
        f"max abs err = {float(jnp.max(jnp.abs(out - ref)))}"
    )
    print("KERNEL_OK")
</pallas_src>

<mosaic_0001>
module attributes {stable_mosaic.version = 11 : i64} {
  func.func @kernel(%arg0: i32, %arg1: i32, %arg2: memref<32x32xf32, #tpu.memory_space<vmem>>, %arg3: memref<32x32xf32, #tpu.memory_space<vmem>>, %arg4: memref<32x32xf32, #tpu.memory_space<vmem>>, %arg5: memref<32x32xf32, #tpu.memory_space<vmem>>, %arg6: memref<32x32xbf16, #tpu.memory_space<vmem>>, %arg7: memref<32x32xbf16, #tpu.memory_space<vmem>>, %arg8: memref<32x32xbf16, #tpu.memory_space<vmem>>, %arg9: memref<32x32xf32, #tpu.memory_space<vmem>>, %arg10: memref<32x32xf32, #tpu.memory_space<vmem>>, %arg11: memref<32x32xf32, #tpu.memory_space<vmem>>) attributes {dimension_semantics = [#tpu.dimension_semantics<parallel>, #tpu.dimension_semantics<arbitrary>], iteration_bounds = array<i64: 1, 1>, scalar_prefetch = 0 : i64, scratch_operands = 3 : i64, tpu.core_type = #tpu.core_type<tc>, window_params = [{transform_indices = @transform_0, window_bounds = array<i64: 32, 32>}, {transform_indices = @transform_1, window_bounds = array<i64: 32, 32>}, {transform_indices = @transform_2, window_bounds = array<i64: 32, 32>}, {transform_indices = @transform_3, window_bounds = array<i64: 32, 32>}, {transform_indices = @transform_4, window_bounds = array<i64: 32, 32>}, {transform_indices = @transform_5, window_bounds = array<i64: 32, 32>}, {transform_indices = @transform_6, window_bounds = array<i64: 32, 32>}]} {
    %c0_i32 = arith.constant 0 : i32
    %0 = arith.cmpi eq, %arg1, %c0_i32 : i32
    %1 = arith.extui %0 : i1 to i32
    %c0_i32_0 = arith.constant 0 : i32
    %2 = arith.cmpi ne, %1, %c0_i32_0 : i32
    scf.if %2 {
      %cst_24 = arith.constant 0.000000e+00 : f32
      %26 = vector.broadcast %cst_24 : f32 to vector<32x32xf32>
      %c0_25 = arith.constant 0 : index
      %c0_26 = arith.constant 0 : index
      %27 = vector.load %arg9[%c0_25, %c0_26] : memref<32x32xf32, #tpu.memory_space<vmem>>, vector<32x32xf32>
      tpu.vector_store %arg9[%c0_25, %c0_26], %26 {strides = array<i32>} : memref<32x32xf32, #tpu.memory_space<vmem>>, vector<32x32xf32>,
      %cst_27 = arith.constant 0.000000e+00 : f32
      %28 = vector.broadcast %cst_27 : f32 to vector<32x32xf32>
      %c0_28 = arith.constant 0 : index
      %c0_29 = arith.constant 0 : index
      %29 = vector.load %arg10[%c0_28, %c0_29] : memref<32x32xf32, #tpu.memory_space<vmem>>, vector<32x32xf32>
      tpu.vector_store %arg10[%c0_28, %c0_29], %28 {strides = array<i32>} : memref<32x32xf32, #tpu.memory_space<vmem>>, vector<32x32xf32>,
      %cst_30 = arith.constant 0.000000e+00 : f32
      %30 = vector.broadcast %cst_30 : f32 to vector<32x32xf32>
      %c0_31 = arith.constant 0 : index
      %c0_32 = arith.constant 0 : index
      %31 = vector.load %arg11[%c0_31, %c0_32] : memref<32x32xf32, #tpu.memory_space<vmem>>, vector<32x32xf32>
      tpu.vector_store %arg11[%c0_31, %c0_32], %30 {strides = array<i32>} : memref<32x32xf32, #tpu.memory_space<vmem>>, vector<32x32xf32>,
    } else {
    }
    %c0 = arith.constant 0 : index
    %c0_1 = arith.constant 0 : index
    %3 = vector.load %arg2[%c0, %c0_1] : memref<32x32xf32, #tpu.memory_space<vmem>>, vector<32x32xf32>
    %4 = arith.truncf %3 : vector<32x32xf32> to vector<32x32xbf16>
    %c0_2 = arith.constant 0 : index
    %c0_3 = arith.constant 0 : index
    %5 = vector.load %arg9[%c0_2, %c0_3] : memref<32x32xf32, #tpu.memory_space<vmem>>, vector<32x32xf32>
    %c0_4 = arith.constant 0 : index
    %c0_5 = arith.constant 0 : index
    %6 = vector.load %arg3[%c0_4, %c0_5] : memref<32x32xf32, #tpu.memory_space<vmem>>, vector<32x32xf32>
    %7 = arith.truncf %6 : vector<32x32xf32> to vector<32x32xbf16>
    %cst = arith.constant dense<0.000000e+00> : vector<32x32xf32>
    %8 = tpu.matmul %4, %7, %cst {dimension_numbers = #tpu.dot_dimension_numbers<[1], [0], [0], [1], [0, 0, 1, 1], [], []>} : vector<32x32xbf16>, vector<32x32xbf16>, vector<32x32xf32> -> vector<32x32xf32>
    %9 = arith.addf %5, %8 : vector<32x32xf32>
    %c0_6 = arith.constant 0 : index
    %c0_7 = arith.constant 0 : index
    %10 = vector.load %arg9[%c0_6, %c0_7] : memref<32x32xf32, #tpu.memory_space<vmem>>, vector<32x32xf32>
    tpu.vector_store %arg9[%c0_6, %c0_7], %9 {strides = array<i32>} : memref<32x32xf32, #tpu.memory_space<vmem>>, vector<32x32xf32>,
    %c0_8 = arith.constant 0 : index
    %c0_9 = arith.constant 0 : index
    %11 = vector.load %arg10[%c0_8, %c0_9] : memref<32x32xf32, #tpu.memory_space<vmem>>, vector<32x32xf32>
    %c0_10 = arith.constant 0 : index
    %c0_11 = arith.constant 0 : index
    %12 = vector.load %arg4[%c0_10, %c0_11] : memref<32x32xf32, #tpu.memory_space<vmem>>, vector<32x32xf32>
    %13 = arith.truncf %12 : vector<32x32xf32> to vector<32x32xbf16>
    %cst_12 = arith.constant dense<0.000000e+00> : vector<32x32xf32>
    %14 = tpu.matmul %4, %13, %cst_12 {dimension_numbers = #tpu.dot_dimension_numbers<[1], [0], [0], [1], [0, 0, 1, 1], [], []>} : vector<32x32xbf16>, vector<32x32xbf16>, vector<32x32xf32> -> vector<32x32xf32>
    %15 = arith.addf %11, %14 : vector<32x32xf32>
    %c0_13 = arith.constant 0 : index
    %c0_14 = arith.constant 0 : index
    %16 = vector.load %arg10[%c0_13, %c0_14] : memref<32x32xf32, #tpu.memory_space<vmem>>, vector<32x32xf32>
    tpu.vector_store %arg10[%c0_13, %c0_14], %15 {strides = array<i32>} : memref<32x32xf32, #tpu.memory_space<vmem>>, vector<32x32xf32>,
    %c0_15 = arith.constant 0 : index
    %c0_16 = arith.constant 0 : index
    %17 = vector.load %arg11[%c0_15, %c0_16] : memref<32x32xf32, #tpu.memory_space<vmem>>, vector<32x32xf32>
    %c0_17 = arith.constant 0 : index
    %c0_18 = arith.constant 0 : index
    %18 = vector.load %arg5[%c0_17, %c0_18] : memref<32x32xf32, #tpu.memory_space<vmem>>, vector<32x32xf32>
    %19 = arith.truncf %18 : vector<32x32xf32> to vector<32x32xbf16>
    %cst_19 = arith.constant dense<0.000000e+00> : vector<32x32xf32>
    %20 = tpu.matmul %4, %19, %cst_19 {dimension_numbers = #tpu.dot_dimension_numbers<[1], [0], [0], [1], [0, 0, 1, 1], [], []>} : vector<32x32xbf16>, vector<32x32xbf16>, vector<32x32xf32> -> vector<32x32xf32>
    %21 = arith.addf %17, %20 : vector<32x32xf32>
    %c0_20 = arith.constant 0 : index
    %c0_21 = arith.constant 0 : index
    %22 = vector.load %arg11[%c0_20, %c0_21] : memref<32x32xf32, #tpu.memory_space<vmem>>, vector<32x32xf32>
    tpu.vector_store %arg11[%c0_20, %c0_21], %21 {strides = array<i32>} : memref<32x32xf32, #tpu.memory_space<vmem>>, vector<32x32xf32>,
    %c0_i32_22 = arith.constant 0 : i32
    %23 = arith.cmpi eq, %arg1, %c0_i32_22 : i32
    %24 = arith.extui %23 : i1 to i32
    %c0_i32_23 = arith.constant 0 : i32
    %25 = arith.cmpi ne, %24, %c0_i32_23 : i32
    scf.if %25 {
      %c0_24 = arith.constant 0 : index
      %c0_25 = arith.constant 0 : index
      %26 = vector.load %arg9[%c0_24, %c0_25] : memref<32x32xf32, #tpu.memory_space<vmem>>, vector<32x32xf32>
      %27 = arith.truncf %26 : vector<32x32xf32> to vector<32x32xbf16>
      %c0_26 = arith.constant 0 : index
      %c0_27 = arith.constant 0 : index
      %28 = vector.load %arg6[%c0_26, %c0_27] : memref<32x32xbf16, #tpu.memory_space<vmem>>, vector<32x32xbf16>
      tpu.vector_store %arg6[%c0_26, %c0_27], %27 {strides = array<i32>} : memref<32x32xbf16, #tpu.memory_space<vmem>>, vector<32x32xbf16>,
      %c0_28 = arith.constant 0 : index
      %c0_29 = arith.constant 0 : index
      %29 = vector.load %arg10[%c0_28, %c0_29] : memref<32x32xf32, #tpu.memory_space<vmem>>, vector<32x32xf32>
      %30 = arith.truncf %29 : vector<32x32xf32> to vector<32x32xbf16>
      %c0_30 = arith.constant 0 : index
      %c0_31 = arith.constant 0 : index
      %31 = vector.load %arg7[%c0_30, %c0_31] : memref<32x32xbf16, #tpu.memory_space<vmem>>, vector<32x32xbf16>
      tpu.vector_store %arg7[%c0_30, %c0_31], %30 {strides = array<i32>} : memref<32x32xbf16, #tpu.memory_space<vmem>>, vector<32x32xbf16>,
      %c0_32 = arith.constant 0 : index
      %c0_33 = arith.constant 0 : index
      %32 = vector.load %arg11[%c0_32, %c0_33] : memref<32x32xf32, #tpu.memory_space<vmem>>, vector<32x32xf32>
      %33 = arith.truncf %32 : vector<32x32xf32> to vector<32x32xbf16>
      %c0_34 = arith.constant 0 : index
      %c0_35 = arith.constant 0 : index
      %34 = vector.load %arg8[%c0_34, %c0_35] : memref<32x32xbf16, #tpu.memory_space<vmem>>, vector<32x32xbf16>
      tpu.vector_store %arg8[%c0_34, %c0_35], %33 {strides = array<i32>} : memref<32x32xbf16, #tpu.memory_space<vmem>>, vector<32x32xbf16>,
    } else {
    }
    return
  }
  func.func @transform_0(%arg0: i32, %arg1: i32) -> (i32, i32) {
    %c0_i32 = arith.constant 0 : i32
    return %arg0, %arg1 : i32, i32
  }
  func.func @transform_1(%arg0: i32, %arg1: i32) -> (i32, i32) {
    %c0_i32 = arith.constant 0 : i32
    %c0_i32_0 = arith.constant 0 : i32
    return %arg1, %c0_i32 : i32, i32
  }
  func.func @transform_2(%arg0: i32, %arg1: i32) -> (i32, i32) {
    %c0_i32 = arith.constant 0 : i32
    %c0_i32_0 = arith.constant 0 : i32
    return %arg1, %c0_i32 : i32, i32
  }
  func.func @transform_3(%arg0: i32, %arg1: i32) -> (i32, i32) {
    %c0_i32 = arith.constant 0 : i32
    %c0_i32_0 = arith.constant 0 : i32
    return %arg1, %c0_i32 : i32, i32
  }
  func.func @transform_4(%arg0: i32, %arg1: i32) -> (i32, i32) {
    %c0_i32 = arith.constant 0 : i32
    %c0_i32_0 = arith.constant 0 : i32
    return %arg0, %c0_i32 : i32, i32
  }
  func.func @transform_5(%arg0: i32, %arg1: i32) -> (i32, i32) {
    %c0_i32 = arith.constant 0 : i32
    %c0_i32_0 = arith.constant 0 : i32
    return %arg0, %c0_i32 : i32, i32
  }
  func.func @transform_6(%arg0: i32, %arg1: i32) -> (i32, i32) {
    %c0_i32 = arith.constant 0 : i32
    %c0_i32_0 = arith.constant 0 : i32
    return %arg0, %c0_i32 : i32, i32
  }
}

</mosaic_0001>

<bundles_post_ra>
// kernel: tpu_custom_call.1
= control target key start
LH: loop header
LB: loop body
LE: loop exit
PB: predicated region body
PF: predicated region fallthrough
CT: control target
= control target key end

     0   :  { %12 = vsyncpa [#allocation6], 0  ;;  %s631_s0 = inlined_call_operand.hbm [shape: f32[32,32], index: 0, kind: input, shape index: {}]   ;;  %s632_s1 = inlined_call_operand.hbm [shape: f32[32,32], index: 1, kind: input, shape index: {}]   ;;  %s633_s2 = inlined_call_operand.hbm [shape: f32[32,32], index: 2, kind: input, shape index: {}]   ;;  %s634_s3 = inlined_call_operand.hbm [shape: f32[32,32], index: 3, kind: input, shape index: {}]   ;;  %s635_s4 = inlined_call_operand.hbm [shape: bf16[32,32], index: 4, kind: output, shape index: {0}]   ;;  %s636_s5 = inlined_call_operand.hbm [shape: bf16[32,32], index: 5, kind: output, shape index: {1}]   ;;  %s637_s6 = inlined_call_operand.hbm [shape: bf16[32,32], index: 6, kind: output, shape index: {2}]  }
   0x1   :  { %13 = vsyncpa [#allocation9], 0 }
   0x2   :  { %14 = vsyncpa [#allocation12], 0 }
   0x3   :  { %15 = vsyncpa [#allocation7], 0 }
   0x4   :  { %16 = vsyncpa [#allocation15], 0  ;;  %s34_s23 = sshll.u32 %s632_s1, 4  ;;  %s521_s24 = smov [#allocation8]   ;;  %s35_s23 = int_to_ptr.hbm [resolvable:$true] %s34_s23 }
   0x5   :  { %s36_s25 = sshll.u32 %s521_s24, 4  ;;  %s21_s28 = sshll.u32 %s631_s0, 4  ;;  %s37_s25 = int_to_ptr.vmem [resolvable:$true] %s36_s25  ;;  %s22_s28 = int_to_ptr.hbm [resolvable:$true] %s21_s28 }
   0x6   :  { %s522_s29 = smov 128   ;;  %s523_s30 = smov 8  }
   0x7   :  { %42 = dma.hbm_to_vmem [thread:$0]  %s35_s23, 512, %s37_s25, [#allocation9], %s522_s29, %s522_s29, %s523_s30  }
   0x8   :  { %s524_s7 = smov [#allocation5]   ;;  %s47_s11 = sshll.u32 %s633_s2, 4  ;;  %s48_s11 = int_to_ptr.hbm [resolvable:$true] %s47_s11 }
   0x9   :  { %s23_s8 = sshll.u32 %s524_s7, 4  ;;  %s60_s13 = sshll.u32 %s634_s3, 4  ;;  %s24_s8 = int_to_ptr.vmem [resolvable:$true] %s23_s8  ;;  %s61_s13 = int_to_ptr.hbm [resolvable:$true] %s60_s13 }
   0xa   :  { %29 = dma.hbm_to_vmem [thread:$0]  %s22_s28, 512, %s24_s8, [#allocation6], %s522_s29, %s522_s29, %s523_s30  }
   0xb   :  { %s525_s14 = smov [#allocation10]   ;;  %s526_s0 = smov [#allocation11]  }
   0xc   :  { %s49_s15 = sshll.u32 %s525_s14, 4  ;;  %s62_s16 = sshll.u32 %s526_s0, 4  ;;  %s50_s15 = int_to_ptr.vmem [resolvable:$true] %s49_s15  ;;  %s63_s16 = int_to_ptr.vmem [resolvable:$true] %s62_s16 }
   0xd   :  { %55 = dma.hbm_to_vmem [thread:$0]  %s48_s11, 512, %s50_s15, [#allocation9], %s522_s29, %s522_s29, %s523_s30  }
   0xe   :  { %68 = dma.hbm_to_vmem [thread:$0]  %s61_s13, 512, %s63_s16, [#allocation12], %s522_s29, %s522_s29, %s523_s30  }
   0xf   :  { %511 = dma.done.wait [#allocation6], 512  }
  0x10   :  { %512 = vsyncadd [#allocation6], 4294966784 }
  0x11   :  { %513 = dma.done.wait [#allocation9], 1024  }
  0x12   :  { %514 = vsyncadd [#allocation9], 4294966272 }
  0x13   :  { %515 = dma.done.wait [#allocation12], 512  }
  0x14   :  { %516 = vsyncadd [#allocation12], 4294966784  ;;  %vm90_vm0 = vcmask 261120   ;;  %v527_v0 = vmov 0.0   ;;  %v159_v1 = vld [vmem:[#allocation10 + $0x10] sm:$0xff]  ;;  %v160_v2 = vld [vmem:[#allocation10 + $0x18] sm:$0xff] }
  0x15   :  { %95 = vst.msk [vmem:[#allocation3] sm:$0xff] %vm90_vm0, %v527_v0  ;;  %v196_v3 = vld [vmem:[#allocation11 + $0x10] sm:$0xff]  ;;  %v162_v4 = vpack.c.bf16 %v160_v2, %v159_v1  ;;  %v197_v5 = vld [vmem:[#allocation11 + $0x18] sm:$0xff]  ;;  %v157_v6 = vld [vmem:[#allocation10] sm:$0xff]  ;;  %vm238_vm1 = vcmask 257024   ;;  %s528_s2 = smov [#allocation13]  }
  0x16   :  { %91 = vst.msk [vmem:[#allocation2] sm:$0xff] %vm90_vm0, %v527_v0  ;;  %v158_v7 = vld [vmem:[#allocation10 + $0x8] sm:$0xff]  ;;  %v199_v8 = vpack.c.bf16 %v197_v5, %v196_v3  ;;  %v194_v9 = vld [vmem:[#allocation11] sm:$0xff]  ;;  %v115_v14 = vld [vmem:[#allocation8 + $0x10] sm:$0xff]  ;;  %s271_s3 = sshll.u32 %s528_s2, 4  ;;  %s273_s19 = sshll.u32 %s635_s4, 4  ;;  %s272_s3 = int_to_ptr.vmem [resolvable:$true] %s271_s3  ;;  %s274_s19 = int_to_ptr.hbm [resolvable:$true] %s273_s19 }
  0x17   :  { %92 = vst.msk [vmem:[#allocation2 + $0x8] sm:$0xff] %vm90_vm0, %v527_v0  ;;  %v195_v10 = vld [vmem:[#allocation11 + $0x8] sm:$0xff]  ;;  %v103_v11 = vld [vmem:[#allocation5] sm:$0xff]  ;;  %169 = vmatpush.bf16.msra.mxu1 %v162_v4  ;;  %v161_v12 = vpack.c.bf16 %v158_v7, %v157_v6  ;;  %v116_v15 = vld [vmem:[#allocation8 + $0x18] sm:$0xff]  ;;  %s529_s4 = smov 64   ;;  %s530_s20 = smov 4  }
  0x18   :  { %93 = vst.msk [vmem:[#allocation2 + $0x10] sm:$0xff] %vm90_vm0, %v527_v0  ;;  %v104_v13 = vld [vmem:[#allocation5 + $0x8] sm:$0xff]  ;;  %206 = vmatpush.bf16.msra.mxu2 %v199_v8  ;;  %v198_v16 = vpack.c.bf16 %v195_v10, %v194_v9  ;;  %v118_v17 = vpack.c.bf16 %v116_v15, %v115_v14  ;;  %v113_v18 = vld [vmem:[#allocation8] sm:$0xff]  ;;  %v105_v22 = vld [vmem:[#allocation5 + $0x10] sm:$0xff]  ;;  %s531_s21 = smov [#allocation14]   ;;  %s286_s25 = sshll.u32 %s636_s5, 4  ;;  %s287_s25 = int_to_ptr.hbm [resolvable:$true] %s286_s25 }
  0x19   :  { %94 = vst.msk [vmem:[#allocation2 + $0x18] sm:$0xff] %vm90_vm0, %v527_v0  ;;  %v114_v19 = vld [vmem:[#allocation8 + $0x8] sm:$0xff]  ;;  %v107_v20 = vpack.c.bf16 %v104_v13, %v103_v11  ;;  %v106_v23 = vld [vmem:[#allocation5 + $0x18] sm:$0xff]  ;;  %s284_s22 = sshll.u32 %s531_s21, 4  ;;  %s532_s26 = smov [#allocation16]   ;;  %s285_s22 = int_to_ptr.vmem [resolvable:$true] %s284_s22 }
  0x1a   :  { %96 = vst.msk [vmem:[#allocation3 + $0x8] sm:$0xff] %vm90_vm0, %v527_v0  ;;  %329 = vmatpush.bf16.msra.mxu3 %v118_v17  ;;  %v117_v21 = vpack.c.bf16 %v114_v19, %v113_v18  ;;  %132 = vmatpush.bf16.msra.mxu0 %v118_v17  ;;  %v108_v24 = vpack.c.bf16 %v106_v23, %v105_v22  ;;  %s297_s27 = sshll.u32 %s532_s26, 4  ;;  %s299_s30 = sshll.u32 %s637_s6, 4  ;;  %s298_s27 = int_to_ptr.vmem [resolvable:$true] %s297_s27  ;;  %s300_s30 = int_to_ptr.hbm [resolvable:$true] %s299_s30 }
  0x1b   :  { %97 = vst.msk [vmem:[#allocation3 + $0x10] sm:$0xff] %vm90_vm0, %v527_v0  ;;  %170 = vmatpush.bf16.msra.mxu1 %v161_v12 }
  0x1c   :  { %98 = vst.msk [vmem:[#allocation3 + $0x18] sm:$0xff] %vm90_vm0, %v527_v0  ;;  %207 = vmatpush.bf16.msra.mxu2 %v198_v16  ;;  %v153_v25 = vld [vmem:[#allocation3] sm:$0xff] }
  0x1d   :  { %99 = vst.msk [vmem:[#allocation4] sm:$0xff] %vm90_vm0, %v527_v0  ;;  %v109_v28 = vld [vmem:[#allocation2] sm:$0xff] }
  0x1e   :  { %100 = vst.msk [vmem:[#allocation4 + $0x8] sm:$0xff] %vm90_vm0, %v527_v0  ;;  %325 = vmatmul.msk.bf16.vlgmr.msra.gmra.mxu1 %vm90_vm0, %v107_v20  ;;  %330 = vmatpush.bf16.msra.mxu3 %v117_v21  ;;  %v110_v40 = vld [vmem:[#allocation2 + $0x8] sm:$0xff] }
  0x1f   :  { %101 = vst.msk [vmem:[#allocation4 + $0x10] sm:$0xff] %vm90_vm0, %v527_v0  ;;  %327 = vmatmul.msk.bf16.vlgmr.msra.gmra.mxu2 %vm90_vm0, %v107_v20  ;;  %133 = vmatpush.bf16.msra.mxu0 %v117_v21  ;;  %v111_v34 = vld [vmem:[#allocation2 + $0x10] sm:$0xff] }
  0x20   :  { %102 = vst.msk [vmem:[#allocation4 + $0x18] sm:$0xff] %vm90_vm0, %v527_v0  ;;  %v112_v49 = vld [vmem:[#allocation2 + $0x18] sm:$0xff] }
  0x21   :  { %324 = vmatmul.msk.bf16.vlgmr.msra.gmra.mxu3 %vm90_vm0, %v108_v24  ;;  %v154_v32 = vld [vmem:[#allocation3 + $0x8] sm:$0xff] }
  0x22   :  { %323 = vmatmul.msk.bf16.vlgmr.msra.gmra.mxu0 %vm90_vm0, %v107_v20  ;;  %v155_v46 = vld [vmem:[#allocation3 + $0x10] sm:$0xff] }
  0x23   :  { %v156_v63 = vld [vmem:[#allocation3 + $0x18] sm:$0xff] }
  0x24   :  { %v190_v30 = vld [vmem:[#allocation4] sm:$0xff] }
  0x25   :  { %v191_v44 = vld [vmem:[#allocation4 + $0x8] sm:$0xff] }
  0x26   :  { %v192_v62 = vld [vmem:[#allocation4 + $0x10] sm:$0xff] }
  0x27   :  { %v193_v12 = vld [vmem:[#allocation4 + $0x18] sm:$0xff] }
  0x2e   :  { %326 = vmatmul.msk.bf16.gmra.mxu1 %vm90_vm0, %v108_v24 }
  0x2f   :  { %328 = vmatmul.msk.bf16.gmra.mxu2 %vm90_vm0, %v108_v24 }
  0x9b   :  { %v172_v26 = vpop.f32.mrf.mxu1 }
  0x9c   :  { %v182_v27 = vadd.f32 %v172_v26, %v153_v25 }
  0x9e   :  { %186 = vst.msk [vmem:[#allocation3] sm:$0xff] %vm90_vm0, %v182_v27 }
  0x9f   :  { %v135_v29 = vpop.f32.mrf.mxu0 }
  0xa0   :  { %v145_v31 = vadd.f32 %v135_v29, %v109_v28 }
  0xa2   :  { %v209_v33 = vpop.f32.mrf.mxu2  ;;  %149 = vst.msk [vmem:[#allocation2] sm:$0xff] %vm90_vm0, %v145_v31 }
  0xa3   :  { %v219_v35 = vadd.f32 %v209_v33, %v190_v30  ;;  %v174_v36 = vpop.f32.mrf.mxu1 }
  0xa4   :  { %v183_v37 = vadd.f32 %v174_v36, %v154_v32  ;;  %v140_v38 = vpop.f32.mrf.mxu3 }
  0xa5   :  { %223 = vst.msk [vmem:[#allocation4] sm:$0xff] %vm90_vm0, %v219_v35  ;;  %v147_v39 = vadd.f32 %v140_v38, %v111_v34  ;;  %v243_v41 = vld [vmem:[#allocation3] sm:$0xff] }
  0xa6   :  { %187 = vst.msk [vmem:[#allocation3 + $0x8] sm:$0xff] %vm90_vm0, %v183_v37  ;;  %v247_v42 = vpack.c.bf16 %v243_v41, %v243_v41 }
  0xa7   :  { %151 = vst.msk [vmem:[#allocation2 + $0x10] sm:$0xff] %vm90_vm0, %v147_v39  ;;  %v137_v43 = vpop.f32.mrf.mxu0 }
  0xa8   :  { %v146_v45 = vadd.f32 %v137_v43, %v110_v40  ;;  %251 = vst.msk [vmem:[#allocation14] sm:$0xf] %vm238_vm1, %v247_v42 }
  0xa9   :  { %v230_v47 = vld [vmem:[#allocation2] sm:$0xff] }
  0xaa   :  { %v211_v48 = vpop.f32.mrf.mxu2  ;;  %150 = vst.msk [vmem:[#allocation2 + $0x8] sm:$0xff] %vm90_vm0, %v146_v45  ;;  %v234_v50 = vpack.c.bf16 %v230_v47, %v230_v47 }
  0xab   :  { %v220_v51 = vadd.f32 %v211_v48, %v191_v44  ;;  %v177_v52 = vpop.f32.mrf.mxu1 }
  0xac   :  { %v184_v53 = vadd.f32 %v177_v52, %v155_v46  ;;  %v142_v54 = vpop.f32.mrf.mxu3  ;;  %239 = vst.msk [vmem:[#allocation13] sm:$0xf] %vm238_vm1, %v234_v50  ;;  %v255_v55 = vld [vmem:[#allocation4] sm:$0xff] }
  0xad   :  { %224 = vst.msk [vmem:[#allocation4 + $0x8] sm:$0xff] %vm90_vm0, %v220_v51  ;;  %v148_v56 = vadd.f32 %v142_v54, %v112_v49  ;;  %v244_v57 = vld [vmem:[#allocation3 + $0x8] sm:$0xff]  ;;  %v259_v60 = vpack.c.bf16 %v255_v55, %v255_v55 }
  0xae   :  { %188 = vst.msk [vmem:[#allocation3 + $0x10] sm:$0xff] %vm90_vm0, %v184_v53  ;;  %v248_v58 = vpack.c.bf16 %v244_v57, %v244_v57  ;;  %v232_v59 = vld [vmem:[#allocation2 + $0x10] sm:$0xff] }
  0xaf   :  { %152 = vst.msk [vmem:[#allocation2 + $0x18] sm:$0xff] %vm90_vm0, %v148_v56  ;;  %v236_v61 = vpack.c.bf16 %v232_v59, %v232_v59 }
  0xb0   :  { %252 = vst.msk [vmem:[#allocation14 + $0x4] sm:$0xf] %vm238_vm1, %v248_v58 }
  0xb1   :  { %v231_v0 = vld [vmem:[#allocation2 + $0x8] sm:$0xff]  ;;  %241 = vst.msk [vmem:[#allocation13 + $0x8] sm:$0xf] %vm238_vm1, %v236_v61 }
  0xb2   :  { %v214_v1 = vpop.f32.mrf.mxu2  ;;  %v235_v2 = vpack.c.bf16 %v231_v0, %v231_v0  ;;  %263 = vst.msk [vmem:[#allocation16] sm:$0xf] %vm238_vm1, %v259_v60 }
  0xb3   :  { %v221_v3 = vadd.f32 %v214_v1, %v192_v62  ;;  %v179_v4 = vpop.f32.mrf.mxu1 }
  0xb4   :  { %v185_v5 = vadd.f32 %v179_v4, %v156_v63  ;;  %240 = vst.msk [vmem:[#allocation13 + $0x4] sm:$0xf] %vm238_vm1, %v235_v2  ;;  %v256_v6 = vld [vmem:[#allocation4 + $0x8] sm:$0xff] }
  0xb5   :  { %225 = vst.msk [vmem:[#allocation4 + $0x10] sm:$0xff] %vm90_vm0, %v221_v3  ;;  %v245_v7 = vld [vmem:[#allocation3 + $0x10] sm:$0xff]  ;;  %v260_v8 = vpack.c.bf16 %v256_v6, %v256_v6 }
  0xb6   :  { %189 = vst.msk [vmem:[#allocation3 + $0x18] sm:$0xff] %vm90_vm0, %v185_v5  ;;  %v249_v9 = vpack.c.bf16 %v245_v7, %v245_v7  ;;  %v233_v10 = vld [vmem:[#allocation2 + $0x18] sm:$0xff] }
  0xb7   :  { %v237_v11 = vpack.c.bf16 %v233_v10, %v233_v10  ;;  %264 = vst.msk [vmem:[#allocation16 + $0x4] sm:$0xf] %vm238_vm1, %v260_v8 }
  0xb8   :  { %253 = vst.msk [vmem:[#allocation14 + $0x8] sm:$0xf] %vm238_vm1, %v249_v9 }
  0xb9   :  { %242 = vst.msk [vmem:[#allocation13 + $0xc] sm:$0xf] %vm238_vm1, %v237_v11 }
  0xba   :  { %v216_v13 = vpop.f32.mrf.mxu2  ;;  %279 = dma.vmem_to_hbm [thread:$0]  %s272_s3, 256, %s274_s19, [#allocation7], %s529_s4, %s529_s4, %s530_s20  }
  0xbb   :  { %v222_v14 = vadd.f32 %v216_v13, %v193_v12 }
  0xbc   :  { %v257_v15 = vld [vmem:[#allocation4 + $0x10] sm:$0xff] }
  0xbd   :  { %226 = vst.msk [vmem:[#allocation4 + $0x18] sm:$0xff] %vm90_vm0, %v222_v14  ;;  %v246_v16 = vld [vmem:[#allocation3 + $0x18] sm:$0xff]  ;;  %v261_v17 = vpack.c.bf16 %v257_v15, %v257_v15 }
  0xbe   :  { %v250_v18 = vpack.c.bf16 %v246_v16, %v246_v16 }
  0xbf   :  { %265 = vst.msk [vmem:[#allocation16 + $0x8] sm:$0xf] %vm238_vm1, %v261_v17 }
  0xc0   :  { %254 = vst.msk [vmem:[#allocation14 + $0xc] sm:$0xf] %vm238_vm1, %v250_v18 }
  0xc1   :  { %292 = dma.vmem_to_hbm [thread:$0]  %s285_s22, 256, %s287_s25, [#allocation15], %s529_s4, %s529_s4, %s530_s20  }
  0xc4   :  { %v258_v19 = vld [vmem:[#allocation4 + $0x18] sm:$0xff] }
  0xc5   :  { %v262_v20 = vpack.c.bf16 %v258_v19, %v258_v19 }
  0xc7   :  { %266 = vst.msk [vmem:[#allocation16 + $0xc] sm:$0xf] %vm238_vm1, %v262_v20 }
  0xc8   :  { %305 = dma.vmem_to_hbm [thread:$0]  %s298_s27, 256, %s300_s30, [#allocation15], %s529_s4, %s529_s4, %s530_s20  }
  0xc9   :  { %517 = dma.done.wait [#allocation7], 256  }
  0xca   :  { %518 = vsyncadd [#allocation7], 4294967040 }
  0xcb   :  { %519 = dma.done.wait [#allocation15], 512  }
  0xcc   :  { %520 = vsyncadd [#allocation15], 4294966784 }
  0xcd   :  { %318 = vsyncpa [#allocation6], 1 }
  0xce   :  { %319 = vsyncpa [#allocation9], 1 }
  0xcf   :  { %320 = vsyncpa [#allocation12], 1 }
  0xd0   :  { %321 = vsyncpa [#allocation7], 1 }
  0xd1   :  { %322 = vsyncpa [#allocation15], 1 }

</bundles_post_ra>
